<compile_context>
chip_gen: v6e
topology: v6e:2x2x1
jax: 0.10.0
libtpu: 0.0.40
codegen_flags: <defaults>
</compile_context>

<pallas_src>
import functools

import jax
import jax.numpy as jnp
from jax import lax
from jax.experimental import pallas as pl
from jax.experimental.pallas import tpu as pltpu


# --------------------------------------------------------------------------- #
# Kernel
# --------------------------------------------------------------------------- #
def _qmodel_kernel(hid_ref, cand_ref, w1h_ref, w1c_bd_ref, b1_ref, w2_bd_ref,
                   b2_ref, o_ref, *, C):
    # hid_ref  : (tm, H)          bf16  hidden rows (one per (b, s))
    # cand_ref : (tm, C*cs)       bf16  candidate rows, candidates along lanes
    # w1h_ref  : (8, H)           bf16  hidden half of first Linear (transposed)
    # w1c_bd   : (8C, C*cs)       bf16  block-diag candidate half of first Linear
    # b1_ref   : (8C, 1)          f32   first-Linear bias, tiled per candidate
    # w2_bd    : (rows_pad, 8C)   bf16  block-diag second Linear (zero-padded rows)
    # b2_ref   : (rows_pad, 1)    f32   second-Linear bias (zero-padded rows)
    # o_ref    : (rows_pad, tm)   f32   lane-dense output, one full store
    #
    # Hidden projection computed once per row tile, reused for all C candidates
    # (Linear(concat([h, c])) == h @ W1_h + c @ W1_c + b1).
    hproj = lax.dot_general(
        w1h_ref[...], hid_ref[...],
        (((1,), (1,)), ((), ())),
        preferred_element_type=jnp.float32)                       # (8, tm)
    cproj = lax.dot_general(
        w1c_bd_ref[...], cand_ref[...],
        (((1,), (1,)), ((), ())),
        preferred_element_type=jnp.float32)                       # (8C, tm)

    pre = jnp.concatenate([hproj] * C, axis=0) + cproj + b1_ref[...]
    h = jnp.maximum(pre, 0.0)                                     # ReLU, (8C, tm)

    out = lax.dot_general(
        w2_bd_ref[...], h.astype(jnp.bfloat16),
        (((1,), (0,)), ((), ())),
        preferred_element_type=jnp.float32) + b2_ref[...]         # (rows_pad, tm)

    o_ref[...] = out.astype(o_ref.dtype)                          # single full store


# --------------------------------------------------------------------------- #
# Tiling helpers (chip-aware)
# --------------------------------------------------------------------------- #
def _round_up(x, m):
    return (x + m - 1) // m * m


def _cdiv(a, b):
    return (a + b - 1) // b


def _chip_config():
    """(tm_max, per-tile VMEM budget, scoped vmem_limit_bytes) per chip gen."""
    try:
        vmem_cap = pltpu.get_tpu_info().vmem_capacity_bytes
    except Exception:  # pragma: no cover - conservative fallback (v7x-safe)
        vmem_cap = 64 * 1024 * 1024
    if vmem_cap >= 100 * 1024 * 1024:          # v5e / v6e: 128 MiB VMEM
        return 1024, 48 * 1024 * 1024, 64 * 1024 * 1024
    # v7x: 64 MiB VMEM per TensorCore -> keep headroom for compiler scratch
    return 512, 24 * 1024 * 1024, 36 * 1024 * 1024


def _pick_tm(BS, H, ccs, tm_max, budget):
    """Row tile: multiple of 128, VMEM-budgeted, even grid-step count preferred."""
    tm = min(tm_max, _round_up(max(BS, 1), 128))
    # Double-buffered bf16 input tiles (hidden + candidates) within the budget.
    while tm > 128 and 2 * 2 * tm * (H + ccs) > budget:
        tm -= 128
    # Prefer an even number of grid steps so a v7x megacore split is balanced.
    if _cdiv(BS, tm) % 2 == 1 and BS > 128:
        for t in range(tm, 127, -128):
            if _cdiv(BS, t) % 2 == 0:
                tm = t
                break
    return tm


# --------------------------------------------------------------------------- #
# pallas_call wrapper
# --------------------------------------------------------------------------- #
def qmodel_mlp(hidden, cand_flat, prepped, *, C):
    """hidden: (BS, H) bf16, cand_flat: (BS, C*cs) bf16 -> (2C, BS) f32."""
    BS, H = hidden.shape
    ccs = cand_flat.shape[1]
    rows = 2 * C
    rows_pad = _round_up(rows, 8)

    tm_max, budget, vmem_limit = _chip_config()
    tm = _pick_tm(BS, H, ccs, tm_max, budget)
    num_tiles = _cdiv(BS, tm)           # no wrapper-side padding of the inputs
    bs_pad = num_tiles * tm             # only the (tiny) output is padded

    out = pl.pallas_call(
        functools.partial(_qmodel_kernel, C=C),
        out_shape=jax.ShapeDtypeStruct((rows_pad, bs_pad), jnp.float32),
        grid_spec=pltpu.PrefetchScalarGridSpec(
            num_scalar_prefetch=0,
            grid=(num_tiles,),
            in_specs=[
                pl.BlockSpec((tm, H), lambda i: (i, 0)),         # hidden rows (once)
                pl.BlockSpec((tm, ccs), lambda i: (i, 0)),       # candidate rows
                pl.BlockSpec((8, H), lambda i: (0, 0)),          # W1 hidden part^T
                pl.BlockSpec((8 * C, ccs), lambda i: (0, 0)),    # W1 cand part, block-diag
                pl.BlockSpec((8 * C, 1), lambda i: (0, 0)),      # b1 tiled
                pl.BlockSpec((rows_pad, 8 * C), lambda i: (0, 0)),  # W2 block-diag
                pl.BlockSpec((rows_pad, 1), lambda i: (0, 0)),   # b2 tiled
            ],
            out_specs=pl.BlockSpec((rows_pad, tm), lambda i: (0, i)),
        ),
        compiler_params=pltpu.CompilerParams(
            dimension_semantics=("parallel",),
            vmem_limit_bytes=vmem_limit),
    )(hidden, cand_flat, prepped["w1h"], prepped["w1c_bd"], prepped["b1_bd"],
      prepped["w2_bd"], prepped["b2_bd"])

    return out[:rows, :BS]


def _prepare_params(params, C):
    """Build bf16 / block-diagonal weights consumed by the kernel."""
    rows = 2 * C
    rows_pad = _round_up(rows, 8)
    eye = jnp.eye(C, dtype=jnp.float32)
    w1c_bd = jnp.kron(eye, params["w1c_t"]).astype(jnp.bfloat16)     # (8C, C*cs)
    w2_bd = jnp.kron(eye, params["w2_t"])                            # (2C, 8C)
    w2_bd = jnp.pad(w2_bd, ((0, rows_pad - rows), (0, 0))).astype(jnp.bfloat16)
    b1_bd = jnp.tile(params["b1"], (C, 1)).astype(jnp.float32)       # (8C, 1)
    b2_bd = jnp.pad(jnp.tile(params["b2"], (C, 1)),
                    ((0, rows_pad - rows), (0, 0))).astype(jnp.float32)
    return {
        "w1h": params["w1h_t"].astype(jnp.bfloat16),                 # (8, H)
        "w1c_bd": w1c_bd,
        "b1_bd": b1_bd,
        "w2_bd": w2_bd,
        "b2_bd": b2_bd,
    }


def qmodel_forward(last_hidden_state, candidate_representation, params):
    """Pallas implementation of Qmodel.forward downstream of the LLM.

    last_hidden_state        : (B, S, H)
    candidate_representation : (B, S, C, cs)
    returns                  : (B, 2, S, C)   float32
    """
    B, S, H = last_hidden_state.shape
    _, _, C, cs = candidate_representation.shape
    BS = B * S

    # Stream inputs in bf16 (the LLM's native output dtype; a no-op cast there).
    hidden = last_hidden_state.reshape(BS, H).astype(jnp.bfloat16)
    cand_flat = candidate_representation.reshape(BS, C * cs).astype(jnp.bfloat16)

    prepped = _prepare_params(params, C)
    out = qmodel_mlp(hidden, cand_flat, prepped, C=C)                # (2C, BS)

    # rows [c0_o0, c0_o1, c1_o0, ...] -> (C,2,B,S) -> (B,2,S,C) == movedim(3,1)
    return jnp.transpose(out.reshape(C, 2, B, S), (2, 1, 3, 0))


# --------------------------------------------------------------------------- #
# Params / reference / demo
# --------------------------------------------------------------------------- #
def init_params(key, hidden_size, candidate_size):
    """Deterministic Linear inits (PyTorch-style bounds), stored transposed."""
    lin_in = hidden_size + candidate_size
    k1, k2, k3, k4 = jax.random.split(key, 4)
    bound1 = 1.0 / jnp.sqrt(lin_in)
    w1_t = jax.random.uniform(k1, (8, lin_in), jnp.float32, -bound1, bound1)
    b1 = jax.random.uniform(k2, (8, 1), jnp.float32, -bound1, bound1)
    bound2 = 1.0 / jnp.sqrt(8.0)
    w2_t = jax.random.uniform(k3, (2, 8), jnp.float32, -bound2, bound2)
    b2 = jax.random.uniform(k4, (2, 1), jnp.float32, -bound2, bound2)
    return {
        "w1h_t": w1_t[:, :hidden_size],   # (8, H)  hidden part of first Linear
        "w1c_t": w1_t[:, hidden_size:],   # (8, cs) candidate part
        "b1": b1,                         # (8, 1)
        "w2_t": w2_t,                     # (2, 8)
        "b2": b2,                         # (2, 1)
    }


def _reference(last_hidden_state, cand, params):
    # Pure-JAX reference matching the PyTorch forward, with matmul operands
    # rounded to bf16 exactly as the kernel streams them (f32 accumulation).
    B, S, H = last_hidden_state.shape
    C = cand.shape[2]
    f32 = jnp.float32
    hid = last_hidden_state.astype(jnp.bfloat16).astype(f32)
    cnd = cand.astype(jnp.bfloat16).astype(f32)
    w1h = params["w1h_t"].astype(jnp.bfloat16).astype(f32)
    w1c = params["w1c_t"].astype(jnp.bfloat16).astype(f32)
    w2 = params["w2_t"].astype(jnp.bfloat16).astype(f32)
    rep = jnp.broadcast_to(hid[:, :, None, :], (B, S, C, H))
    full = jnp.concatenate([rep, cnd], axis=-1)
    w1 = jnp.concatenate([w1h, w1c], axis=1).T                  # (H+cs, 8)
    h = jnp.maximum(full @ w1 + params["b1"][:, 0], 0.0)
    h = h.astype(jnp.bfloat16).astype(f32)
    red = h @ w2.T + params["b2"][:, 0]
    return jnp.moveaxis(red, 3, 1)


if __name__ == "__main__":
    # TODO(synk): the pretrained AutoModel LLM has no Pallas translation here;
    # its last_hidden_state is supplied directly as a deterministic input.
    B, S, H = 2, 8, 32          # batch, seq, llm hidden_size
    C, CS = 4, 16               # candidates_number, candidate_size

    key = jax.random.PRNGKey(0)
    k_h, k_c, k_p = jax.random.split(key, 3)
    last_hidden_state = jax.random.normal(k_h, (B, S, H), jnp.float32)
    candidate_representation = jax.random.normal(k_c, (B, S, C, CS), jnp.float32)
    params = init_params(k_p, H, CS)

    out = qmodel_forward(last_hidden_state, candidate_representation, params)
    out = jax.block_until_ready(out)
    assert out.shape == (B, 2, S, C), out.shape

    ref = _reference(last_hidden_state, candidate_representation, params)
    assert jnp.allclose(out, ref, atol=1e-3, rtol=1e-3), "mismatch vs reference"

    print("KERNEL_OK")
</pallas_src>

<mosaic_0001>
module attributes {stable_mosaic.version = 11 : i64} {
  func.func @_qmodel_kernel(%arg0: i32, %arg1: memref<128x32xbf16, #tpu.memory_space<vmem>>, %arg2: memref<128x64xbf16, #tpu.memory_space<vmem>>, %arg3: memref<8x32xbf16, #tpu.memory_space<vmem>>, %arg4: memref<32x64xbf16, #tpu.memory_space<vmem>>, %arg5: memref<32x1xf32, #tpu.memory_space<vmem>>, %arg6: memref<8x32xbf16, #tpu.memory_space<vmem>>, %arg7: memref<8x1xf32, #tpu.memory_space<vmem>>, %arg8: memref<8x128xf32, #tpu.memory_space<vmem>>) attributes {dimension_semantics = [#tpu.dimension_semantics<parallel>], iteration_bounds = array<i64: 1>, scalar_prefetch = 0 : i64, scratch_operands = 0 : i64, tpu.core_type = #tpu.core_type<tc>, window_params = [{transform_indices = @transform_0, window_bounds = array<i64: 128, 32>}, {transform_indices = @transform_1, window_bounds = array<i64: 128, 64>}, {pipeline_mode = #tpu.pipeline_mode<synchronous>, transform_indices = @transform_2, window_bounds = array<i64: 8, 32>}, {pipeline_mode = #tpu.pipeline_mode<synchronous>, transform_indices = @transform_3, window_bounds = array<i64: 32, 64>}, {pipeline_mode = #tpu.pipeline_mode<synchronous>, transform_indices = @transform_4, window_bounds = array<i64: 32, 1>}, {pipeline_mode = #tpu.pipeline_mode<synchronous>, transform_indices = @transform_5, window_bounds = array<i64: 8, 32>}, {pipeline_mode = #tpu.pipeline_mode<synchronous>, transform_indices = @transform_6, window_bounds = array<i64: 8, 1>}, {transform_indices = @transform_7, window_bounds = array<i64: 8, 128>}]} {
    %c0 = arith.constant 0 : index
    %c0_0 = arith.constant 0 : index
    %0 = vector.load %arg3[%c0, %c0_0] : memref<8x32xbf16, #tpu.memory_space<vmem>>, vector<8x32xbf16>
    %c0_1 = arith.constant 0 : index
    %c0_2 = arith.constant 0 : index
    %1 = vector.load %arg1[%c0_1, %c0_2] : memref<128x32xbf16, #tpu.memory_space<vmem>>, vector<128x32xbf16>
    %cst = arith.constant dense<0.000000e+00> : vector<8x128xf32>
    %2 = tpu.matmul %0, %1, %cst {dimension_numbers = #tpu.dot_dimension_numbers<[1], [1], [0], [0], [0, 0, 1, 0], [], []>} : vector<8x32xbf16>, vector<128x32xbf16>, vector<8x128xf32> -> vector<8x128xf32>
    %c0_3 = arith.constant 0 : index
    %c0_4 = arith.constant 0 : index
    %3 = vector.load %arg4[%c0_3, %c0_4] : memref<32x64xbf16, #tpu.memory_space<vmem>>, vector<32x64xbf16>
    %c0_5 = arith.constant 0 : index
    %c0_6 = arith.constant 0 : index
    %4 = vector.load %arg2[%c0_5, %c0_6] : memref<128x64xbf16, #tpu.memory_space<vmem>>, vector<128x64xbf16>
    %cst_7 = arith.constant dense<0.000000e+00> : vector<32x128xf32>
    %5 = tpu.matmul %3, %4, %cst_7 {dimension_numbers = #tpu.dot_dimension_numbers<[1], [1], [0], [0], [0, 0, 1, 0], [], []>} : vector<32x64xbf16>, vector<128x64xbf16>, vector<32x128xf32> -> vector<32x128xf32>
    %6 = tpu.concatenate %2, %2, %2, %2 in 0 : vector<8x128xf32>, vector<8x128xf32>, vector<8x128xf32>, vector<8x128xf32> -> vector<32x128xf32>
    %7 = arith.addf %6, %5 : vector<32x128xf32>
    %c0_8 = arith.constant 0 : index
    %c0_9 = arith.constant 0 : index
    %8 = vector.load %arg5[%c0_8, %c0_9] : memref<32x1xf32, #tpu.memory_space<vmem>>, vector<32x1xf32>
    %9 = vector.broadcast %8 : vector<32x1xf32> to vector<32x128xf32>
    %10 = arith.addf %7, %9 : vector<32x128xf32>
    %cst_10 = arith.constant 0.000000e+00 : f32
    %11 = vector.broadcast %cst_10 : f32 to vector<32x128xf32>
    %12 = arith.maximumf %10, %11 : vector<32x128xf32>
    %c0_11 = arith.constant 0 : index
    %c0_12 = arith.constant 0 : index
    %13 = vector.load %arg6[%c0_11, %c0_12] : memref<8x32xbf16, #tpu.memory_space<vmem>>, vector<8x32xbf16>
    %14 = arith.truncf %12 : vector<32x128xf32> to vector<32x128xbf16>
    %cst_13 = arith.constant dense<0.000000e+00> : vector<8x128xf32>
    %15 = tpu.matmul %13, %14, %cst_13 {dimension_numbers = #tpu.dot_dimension_numbers<[1], [0], [0], [1], [0, 0, 1, 1], [], []>} : vector<8x32xbf16>, vector<32x128xbf16>, vector<8x128xf32> -> vector<8x128xf32>
    %c0_14 = arith.constant 0 : index
    %c0_15 = arith.constant 0 : index
    %16 = vector.load %arg7[%c0_14, %c0_15] : memref<8x1xf32, #tpu.memory_space<vmem>>, vector<8x1xf32>
    %17 = vector.broadcast %16 : vector<8x1xf32> to vector<8x128xf32>
    %18 = arith.addf %15, %17 : vector<8x128xf32>
    %c0_16 = arith.constant 0 : index
    %c0_17 = arith.constant 0 : index
    %19 = vector.load %arg8[%c0_16, %c0_17] : memref<8x128xf32, #tpu.memory_space<vmem>>, vector<8x128xf32>
    tpu.vector_store %arg8[%c0_16, %c0_17], %18 {strides = array<i32>} : memref<8x128xf32, #tpu.memory_space<vmem>>, vector<8x128xf32>,
    return
  }
  func.func @transform_0(%arg0: i32) -> (i32, i32) {
    %c0_i32 = arith.constant 0 : i32
    %c0_i32_0 = arith.constant 0 : i32
    return %arg0, %c0_i32 : i32, i32
  }
  func.func @transform_1(%arg0: i32) -> (i32, i32) {
    %c0_i32 = arith.constant 0 : i32
    %c0_i32_0 = arith.constant 0 : i32
    return %arg0, %c0_i32 : i32, i32
  }
  func.func @transform_2(%arg0: i32) -> (i32, i32) {
    %c0_i32 = arith.constant 0 : i32
    %c0_i32_0 = arith.constant 0 : i32
    %c0_i32_1 = arith.constant 0 : i32
    return %c0_i32, %c0_i32_0 : i32, i32
  }
  func.func @transform_3(%arg0: i32) -> (i32, i32) {
    %c0_i32 = arith.constant 0 : i32
    %c0_i32_0 = arith.constant 0 : i32
    %c0_i32_1 = arith.constant 0 : i32
    return %c0_i32, %c0_i32_0 : i32, i32
  }
  func.func @transform_4(%arg0: i32) -> (i32, i32) {
    %c0_i32 = arith.constant 0 : i32
    %c0_i32_0 = arith.constant 0 : i32
    %c0_i32_1 = arith.constant 0 : i32
    return %c0_i32, %c0_i32_0 : i32, i32
  }
  func.func @transform_5(%arg0: i32) -> (i32, i32) {
    %c0_i32 = arith.constant 0 : i32
    %c0_i32_0 = arith.constant 0 : i32
    %c0_i32_1 = arith.constant 0 : i32
    return %c0_i32, %c0_i32_0 : i32, i32
  }
  func.func @transform_6(%arg0: i32) -> (i32, i32) {
    %c0_i32 = arith.constant 0 : i32
    %c0_i32_0 = arith.constant 0 : i32
    %c0_i32_1 = arith.constant 0 : i32
    return %c0_i32, %c0_i32_0 : i32, i32
  }
  func.func @transform_7(%arg0: i32) -> (i32, i32) {
    %c0_i32 = arith.constant 0 : i32
    %c0_i32_0 = arith.constant 0 : i32
    return %c0_i32, %arg0 : i32, i32
  }
}

</mosaic_0001>

<bundles_post_ra>
// kernel: tpu_custom_call.1
= control target key start
LH: loop header
LB: loop body
LE: loop exit
PB: predicated region body
PF: predicated region fallthrough
CT: control target
= control target key end

     0   :  { %v552_v1 = vmov 0.0   ;;  %vm223_vm0 = vcmask 523264   ;;  %vm85_vm1 = vcmask 261120   ;;  %vm553_vm2 = vmmov 0   ;;  %s716_s0 = inlined_call_operand.vmem [shape: bf16[16,32], index: 0, kind: input, shape index: {}]   ;;  %s717_s1 = inlined_call_operand.vmem [shape: bf16[16,64], index: 1, kind: input, shape index: {}]   ;;  %s718_s2 = inlined_call_operand.vmem [shape: bf16[8,32], index: 2, kind: input, shape index: {}]   ;;  %s719_s3 = inlined_call_operand.vmem [shape: bf16[32,64], index: 3, kind: input, shape index: {}]   ;;  %s720_s4 = inlined_call_operand.vmem [shape: f32[32,1], index: 4, kind: input, shape index: {}]   ;;  %s721_s5 = inlined_call_operand.vmem [shape: bf16[8,32], index: 5, kind: input, shape index: {}]   ;;  %s722_s6 = inlined_call_operand.vmem [shape: f32[8,1], index: 6, kind: input, shape index: {}]   ;;  %s723_s7 = inlined_call_operand.hbm [shape: f32[8,128], index: 7, kind: output, shape index: {}]  }
   0x1   :  { %v512_v0 = vld [vmem:[%s717_s1 + $0x38] sm:$0xff]   ;;  %450 = vmatprep.subr.bf16.mxu0 %v552_v1  ;;  %v514_v5 = vld [vmem:[%s717_s1 + $0x30] sm:$0xff]   ;;  %466 = vmatprep.mubr.msk.bf16.mxu0 %vm553_vm2, %v552_v1  ;;  %v516_v8 = vld [vmem:[%s717_s1 + $0x28] sm:$0xff]  }
   0x2   :  { %v513_v2 = vld [vmem:[%s716_s0 + $0x38] sm:$0xff]   ;;  %498 = vmatprep.subr.msk.bf16.mxu1 %vm223_vm0, %v512_v0  ;;  %v252_v3 = vsel %vm223_vm0, %v512_v0, 0  ;;  %v515_v6 = vld [vmem:[%s716_s0 + $0x30] sm:$0xff]   ;;  %v249_v7 = vsel %vm223_vm0, %v514_v5, 0  ;;  %v517_v10 = vld [vmem:[%s716_s0 + $0x28] sm:$0xff]   ;;  %v246_v11 = vsel %vm223_vm0, %v516_v8, 0 }
   0x3   :  { %v111_v4 = vsel %vm85_vm1, %v513_v2, 0  ;;  %471 = vmatpush3.bf16.xpose.msra.mxu1 %v252_v3  ;;  %v108_v9 = vsel %vm85_vm1, %v515_v6, 0  ;;  %v518_v12 = vld [vmem:[%s717_s1 + $0x20] sm:$0xff]   ;;  %v105_v13 = vsel %vm85_vm1, %v517_v10, 0  ;;  %v309_v15 = vld [vmem:[%s720_s4 + $0x10] sm:$0xff] }
   0x4   :  { %451 = vmatpush3.bf16.xpose.msra.mxu0 %v111_v4  ;;  %499 = vmatprep.subr.msk.bf16.mxu1 %vm223_vm0, %v514_v5  ;;  %v528_v14 = vld [vmem:[%s719_s3] sm:$0xff]  }
   0x5   :  { %452 = vmatprep.subr.bf16.mxu0 %v552_v1  ;;  %486 = vmatprep.mubr.msk.bf16.mxu1 %vm223_vm0, %v528_v14  ;;  %v307_v16 = vld [vmem:[%s720_s4] sm:$0xff] }
   0xb   :  { %473 = vmatpush3.bf16.xpose.msra.mxu1 %v249_v7 }
   0xc   :  { %453 = vmatpush3.bf16.xpose.msra.mxu0 %v108_v9  ;;  %500 = vmatprep.subr.msk.bf16.mxu1 %vm223_vm0, %v516_v8 }
   0xd   :  { %454 = vmatprep.subr.bf16.mxu0 %v552_v1 }
  0x13   :  { %475 = vmatpush3.bf16.xpose.msra.mxu1 %v246_v11 }
  0x14   :  { %455 = vmatpush3.bf16.xpose.msra.mxu0 %v105_v13  ;;  %501 = vmatprep.subr.msk.bf16.mxu1 %vm223_vm0, %v518_v12 }
  0x15   :  { %12 = vsyncpa [#allocation3], 0  ;;  %456 = vmatprep.subr.bf16.mxu0 %v552_v1  ;;  %v519_v17 = vld [vmem:[%s716_s0 + $0x20] sm:$0xff]   ;;  %v554_v18 = vmov 0   ;;  %v310_v19 = vld [vmem:[%s720_s4 + $0x18] sm:$0xff]  ;;  %v243_v20 = vsel %vm223_vm0, %v518_v12, 0 }
  0x16   :  { %510 = vset.pattern.permute.xlu0 %v554_v18  ;;  %511 = vset.pattern.permute.xlu1 %v554_v18  ;;  %v520_v21 = vld [vmem:[%s717_s1 + $0x18] sm:$0xff]   ;;  %v308_v22 = vld [vmem:[%s720_s4 + $0x8] sm:$0xff]  ;;  %v102_v23 = vsel %vm85_vm1, %v519_v17, 0  ;;  %v342_v24 = vld [vmem:[%s722_s6] sm:$0xff] }
  0x17   :  { %323 = vperm.xlu0 %510, %v309_v15   ;;  %313 = vperm.xlu1 %511, %v307_v16   ;;  %v521_v25 = vld [vmem:[%s716_s0 + $0x18] sm:$0xff]   ;;  %v240_v26 = vsel %vm223_vm0, %v520_v21, 0  ;;  %v522_v27 = vld [vmem:[%s717_s1 + $0x10] sm:$0xff]   ;;  %v524_v31 = vld [vmem:[%s717_s1 + $0x8] sm:$0xff]  }
  0x18   :  { %v99_v28 = vsel %vm85_vm1, %v521_v25, 0  ;;  %v523_v29 = vld [vmem:[%s716_s0 + $0x10] sm:$0xff]   ;;  %v237_v30 = vsel %vm223_vm0, %v522_v27, 0  ;;  %v525_v33 = vld [vmem:[%s716_s0 + $0x8] sm:$0xff]   ;;  %v234_v34 = vsel %vm223_vm0, %v524_v31, 0  ;;  %v526_v35 = vld [vmem:[%s717_s1] sm:$0xff]  }
  0x19   :  { %v96_v32 = vsel %vm85_vm1, %v523_v29, 0  ;;  %v93_v36 = vsel %vm85_vm1, %v525_v33, 0  ;;  %v527_v37 = vld [vmem:[%s716_s0] sm:$0xff]   ;;  %v231_v38 = vsel %vm223_vm0, %v526_v35, 0  ;;  %v529_v40 = vld [vmem:[%s719_s3 + $0x8] sm:$0xff]   ;;  %s555_s3 = smov [#allocation2]  }
  0x1a   :  { %v90_v39 = vsel %vm85_vm1, %v527_v37, 0  ;;  %v28_v41 = vld [vmem:[%s718_s2] sm:$0xf]  ;;  %s398_s23 = sshll.u32 %s555_s3, 4  ;;  %s399_s23 = int_to_ptr.vmem [resolvable:$true] %s398_s23 }
  0x1b   :  { %328 = vperm.xlu0 %510, %v310_v19   ;;  %477 = vmatpush3.bf16.xpose.msra.mxu1 %v243_v20  ;;  %v339_v5 = vld [vmem:[%s721_s5] sm:$0xf]  ;;  %s530_s24 = scalar_lea.vmem %s399_s23, 128  ;;  %p535_p1 = scmp.lt.s32.totalorder %s399_s23, %s399_s23 }
  0x1c   :  { %318 = vperm.xlu1 %511, %v308_v22   ;;  %457 = vmatpush3.bf16.xpose.msra.mxu0 %v102_v23  ;;  %p531_p0 = scmp.ne.s32.totalorder %s399_s23, %s530_s24  ;;  %p536_p2 = scmp.lt.s32.totalorder %s530_s24, %s530_s24 }
  0x1d   :  { %502 = vmatprep.subr.msk.bf16.mxu1 %vm223_vm0, %v520_v21  ;;  %458 = vmatprep.subr.bf16.mxu0 %v552_v1 }
  0x1e   :  { %p537_p3 = por %p536_p2, %p535_p1 }
  0x1f   :  { %345 = vperm.xlu0 %510, %v342_v24  }
  0x20   :  { %p538_p4 = pnand %p537_p3, %p531_p0 }
  0x23   :  { %479 = vmatpush3.bf16.xpose.msra.mxu1 %v240_v26 }
  0x24   :  { %459 = vmatpush3.bf16.xpose.msra.mxu0 %v99_v28  ;;  %503 = vmatprep.subr.msk.bf16.mxu1 %vm223_vm0, %v522_v27 }
  0x25   :  { %460 = vmatprep.subr.bf16.mxu0 %v552_v1 }
  0x2b   :  { %481 = vmatpush3.bf16.xpose.msra.mxu1 %v237_v30 }
  0x2c   :  { %461 = vmatpush3.bf16.xpose.msra.mxu0 %v96_v32  ;;  %504 = vmatprep.subr.msk.bf16.mxu1 %vm223_vm0, %v524_v31 }
  0x2d   :  { %462 = vmatprep.subr.bf16.mxu0 %v552_v1 }
  0x33   :  { %483 = vmatpush3.bf16.xpose.msra.mxu1 %v234_v34 }
  0x34   :  { %463 = vmatpush3.bf16.xpose.msra.mxu0 %v93_v36  ;;  %505 = vmatprep.subr.msk.bf16.mxu1 %vm223_vm0, %v526_v35 }
  0x35   :  { %464 = vmatprep.subr.bf16.mxu0 %v552_v1 }
  0x3b   :  { %485 = vmatpush3.bf16.xpose.msra.mxu1 %v231_v38 }
  0x3c   :  { %465 = vmatpush3.bf16.xpose.msra.mxu0 %v90_v39 }
  0x3d   :  { %490 = vmatprep.subr.bf16.mxu0 %v552_v1 }
  0x42   :  { %487 = vmatmul.mubr.msk.bf16.vlgmr.msra.gmra.mxu1 %vm223_vm0, %v529_v40 }
  0x43   :  { %467 = vmatmul.mubr.msk.bf16.vlgmr.msra.gmra.mxu0 %vm85_vm1, %v28_v41 }
  0x44   :  { %494 = vmatprep.mubr.msk.bf16.mxu0 %vm553_vm2, %v552_v1 }
  0x92   :  { %v324_v42 = vpop.permute.xlu0 %323  ;;  %v314_v46 = vpop.permute.xlu1 %313 }
  0x96   :  { %v329_v54 = vpop.permute.xlu0 %328 }
  0x97   :  { %v319_v59 = vpop.permute.xlu1 %318 }
  0x9a   :  { %v346_v6 = vpop.permute.xlu0 %345 }
 0x102   :  { %v488_v43 = vpop.f32.mrf.mxu1 }
 0x103   :  { %v147_v44 = vpop.f32.mrf.mxu0 }
 0x104   :  { %v305_v45 = vadd.f32 %v488_v43, %v147_v44  ;;  %v288_v47 = vpop.f32.mrf.mxu1 }
 0x105   :  { %v468_v48 = vpop.f32.mrf.mxu0  ;;  %v303_v51 = vadd.f32 %v288_v47, %v147_v44 }
 0x106   :  { %v489_v49 = vpop.f32.mrf.mxu1  ;;  %v333_v50 = vadd.f32 %v324_v42, %v305_v45 }
 0x107   :  { %v150_v52 = vpop.f32.mrf.mxu0  ;;  %v306_v53 = vadd.f32 %v489_v49, %v147_v44  ;;  %v331_v61 = vadd.f32 %v314_v46, %v303_v51 }
 0x108   :  { %v291_v55 = vpop.f32.mrf.mxu1  ;;  %v337_v60 = vmax.f32 %v333_v50, 0.0 }
 0x109   :  { %v334_v56 = vadd.f32 %v329_v54, %v306_v53  ;;  %v469_v57 = vpop.f32.mrf.mxu0  ;;  %v304_v58 = vadd.f32 %v291_v55, %v147_v44  ;;  %v335_v3 = vmax.f32 %v331_v61, 0.0 }
 0x10b   :  { %v338_v62 = vmax.f32 %v334_v56, 0.0  ;;  %v332_v63 = vadd.f32 %v319_v59, %v304_v58 }
 0x10d   :  { %v341_v0 = vpack.c.bf16 %v338_v62, %v337_v60  ;;  %v336_v2 = vmax.f32 %v332_v63, 0.0 }
 0x10f   :  { %491 = vmatpush3.bf16.msra.mxu0 %v341_v0  ;;  %v340_v4 = vpack.c.bf16 %v336_v2, %v335_v3 }
 0x110   :  { %492 = vmatprep.subr.bf16.mxu0 %v552_v1 }
 0x113   :  { %493 = vmatpush3.bf16.msra.mxu0 %v340_v4 }
 0x116   :  { %495 = vmatmul.mubr.msk.bf16.vlgmr.msra.gmra.mxu0 %vm85_vm1, %v339_v5 }
 0x1d6   :  { %v385_v7 = vpop.f32.mrf.mxu0 }
 0x1d7   :  { %v386_v8 = vadd.f32 %v385_v7, %v346_v6 }
 0x1d8   :  { %v496_v9 = vpop.f32.mrf.mxu0 }
 0x1d9   :  { %391 = vst [vmem:[#allocation2] sm:$0xff] %v386_v8 }
 0x1da   :  { %v388_v10 = vpop.f32.mrf.mxu0 }
 0x1db   :  { %541 = shalt.err (!%p538_p4)
}
 0x1dc   :  { %401 = dma.vmem_to_hbm [thread:$0]  %s399_s23, 128, %s723_s7, [#allocation3]   ;;  %v497_v1 = vpop.f32.mrf.mxu0 }
 0x1dd   :  { %550 = dma.done.wait [#allocation3], 128  }
 0x1de   :  { %551 = vsyncadd [#allocation3], 4294967168 }
 0x1df   :  { %405 = vsyncpa [#allocation3], 1 }

</bundles_post_ra>
